<compile_context>
chip_gen: v6e
topology: v6e:2x2x1
jax: 0.10.0
libtpu: 0.0.40
codegen_flags: <defaults>
</compile_context>

<pallas_src>
import jax
import jax.numpy as jnp
from jax.experimental import pallas as pl
from jax.experimental.pallas import tpu as pltpu


def mfm_kernel(x_ref, o_ref):
    # x_ref: (1, 2, C//2, t_hw)  -- the two channel halves as separate slabs
    # o_ref: (1, C//2, t_hw)
    # Lane axis (last dim) is H*W -> full-width loads/stores, no masked vst.
    o_ref[0] = jnp.maximum(x_ref[0, 0], x_ref[0, 1])


def _pick_hw_tile(hw, max_tile=2048):
    """Largest tile that divides hw, is a multiple of 128, and is <= max_tile.

    Falls back to the full extent if hw is not a multiple of 128 (a full-extent
    block is always legal for Pallas).
    """
    if hw % 128 != 0:
        return hw
    t = min(hw, max_tile)
    while hw % t != 0:
        t -= 128
    return t


def mfm_forward(x_nchw):
    n, c, h, w = x_nchw.shape
    if c % 2 != 0:
        raise ValueError("amount of channels for MFM 2/1 must be an even number.")
    half = c // 2
    hw = h * w
    t_hw = _pick_hw_tile(hw)

    # Free reshape: splits the channel axis into (first half, second half) and
    # puts H*W on the lane (last) dimension.  No data duplication in HBM.
    x = x_nchw.reshape(n, 2, half, hw)

    out_flat = pl.pallas_call(
        mfm_kernel,
        out_shape=jax.ShapeDtypeStruct((n, half, hw), x_nchw.dtype),
        grid_spec=pltpu.PrefetchScalarGridSpec(
            num_scalar_prefetch=0,
            grid=(n, hw // t_hw),
            in_specs=[
                pl.BlockSpec((1, 2, half, t_hw), lambda b, j: (b, 0, 0, j)),
            ],
            out_specs=pl.BlockSpec((1, half, t_hw), lambda b, j: (b, 0, j)),
        ),
        compiler_params=pltpu.CompilerParams(
            dimension_semantics=("parallel", "parallel")),
    )(x)

    # Output is already channel-major (NCHW) -- just restore the spatial dims.
    return out_flat.reshape(n, half, h, w)


def mfm_reference(x_nchw):
    """Pure-JAX reference matching the PyTorch MFM module."""
    c = x_nchw.shape[1]
    return jnp.maximum(x_nchw[:, : c // 2], x_nchw[:, c // 2:])


if __name__ == "__main__":
    # MFM(in_channels=4) on a (2, 4, 16, 16) NCHW input.
    N, C, H, W = 2, 4, 16, 16

    key = jax.random.PRNGKey(0)
    x = jax.random.normal(key, (N, C, H, W), jnp.float32)

    out = mfm_forward(x)
    out = jax.block_until_ready(out)

    ref = mfm_reference(x)
    ref = jax.block_until_ready(ref)

    assert out.shape == (N, C // 2, H, W), out.shape
    assert jnp.allclose(out, ref), "mismatch vs JAX reference"

    print("KERNEL_OK")
</pallas_src>

<mosaic_0001>
module attributes {stable_mosaic.version = 11 : i64} {
  func.func @mfm_kernel(%arg0: i32, %arg1: i32, %arg2: memref<1x2x2x256xf32, #tpu.memory_space<vmem>>, %arg3: memref<1x2x256xf32, #tpu.memory_space<vmem>>) attributes {dimension_semantics = [#tpu.dimension_semantics<parallel>, #tpu.dimension_semantics<parallel>], iteration_bounds = array<i64: 2, 1>, scalar_prefetch = 0 : i64, scratch_operands = 0 : i64, tpu.core_type = #tpu.core_type<tc>, window_params = [{transform_indices = @transform_0, window_bounds = array<i64: 1, 2, 2, 256>}, {transform_indices = @transform_1, window_bounds = array<i64: 1, 2, 256>}]} {
    %c0 = arith.constant 0 : index
    %c0_0 = arith.constant 0 : index
    %c0_1 = arith.constant 0 : index
    %c0_2 = arith.constant 0 : index
    %0 = vector.load %arg2[%c0, %c0_0, %c0_1, %c0_2] : memref<1x2x2x256xf32, #tpu.memory_space<vmem>>, vector<1x1x2x256xf32>
    %1 = vector.shape_cast %0 : vector<1x1x2x256xf32> to vector<2x256xf32>
    %c0_3 = arith.constant 0 : index
    %c1 = arith.constant 1 : index
    %c0_4 = arith.constant 0 : index
    %c0_5 = arith.constant 0 : index
    %2 = vector.load %arg2[%c0_3, %c1, %c0_4, %c0_5] : memref<1x2x2x256xf32, #tpu.memory_space<vmem>>, vector<1x1x2x256xf32>
    %3 = vector.shape_cast %2 : vector<1x1x2x256xf32> to vector<2x256xf32>
    %4 = arith.maximumf %1, %3 : vector<2x256xf32>
    %c0_6 = arith.constant 0 : index
    %c0_7 = arith.constant 0 : index
    %c0_8 = arith.constant 0 : index
    %5 = vector.load %arg3[%c0_6, %c0_7, %c0_8] : memref<1x2x256xf32, #tpu.memory_space<vmem>>, vector<1x2x256xf32>
    %6 = vector.shape_cast %5 : vector<1x2x256xf32> to vector<2x256xf32>
    %7 = vector.shape_cast %4 : vector<2x256xf32> to vector<1x2x256xf32>
    tpu.vector_store %arg3[%c0_6, %c0_7, %c0_8], %7 {strides = array<i32>} : memref<1x2x256xf32, #tpu.memory_space<vmem>>, vector<1x2x256xf32>,
    return
  }
  func.func @transform_0(%arg0: i32, %arg1: i32) -> (i32, i32, i32, i32) {
    %c0_i32 = arith.constant 0 : i32
    %c0_i32_0 = arith.constant 0 : i32
    %c0_i32_1 = arith.constant 0 : i32
    return %arg0, %c0_i32, %c0_i32_0, %arg1 : i32, i32, i32, i32
  }
  func.func @transform_1(%arg0: i32, %arg1: i32) -> (i32, i32, i32) {
    %c0_i32 = arith.constant 0 : i32
    %c0_i32_0 = arith.constant 0 : i32
    return %arg0, %c0_i32, %arg1 : i32, i32, i32
  }
}

</mosaic_0001>

<bundles_post_ra>
// kernel: tpu_custom_call.1
= control target key start
LH: loop header
LB: loop body
LE: loop exit
PB: predicated region body
PF: predicated region fallthrough
CT: control target
= control target key end

     0   :  { %6 = vsyncpa [#allocation3], 0  ;;  %s600_s0 = inlined_call_operand.hbm [shape: f32[2,2,2,256], index: 0, kind: input, shape index: {}]   ;;  %s601_s1 = inlined_call_operand.hbm [shape: f32[2,2,256], index: 1, kind: output, shape index: {}]  }
   0x1   :  { %8 = vsyncpa [#allocation3 + $0x1], 0 }
   0x2   :  { %9 = vsyncpa [#allocation4], 0 }
   0x3   :  { %11 = vsyncpa [#allocation4 + $0x1], 0  ;;  %s467_s6 = smov 0   ;;  %s469_s7 = smov 0  }
   0x4   :  { %s471_s8 = smov 0   ;;  %s473_s9 = smov 0  }
   0x5   :  { %s475_s10 = smov 0   ;;  %s477_s11 = smov 0  }
   0x6 LB: > { %s261_s12 = sadd.s32 4294967295, %s451_s11   ;;  %s262_s13 = sadd.s32 4294967294, %s451_s11   ;;  %s451_s11 = sphi %s477_s11, %s17_s11   ;;  %s447_s10 = sphi %s475_s10, %s612_s10   ;;  %s443_s9 = sphi %s473_s9, %s611_s9   ;;  %s439_s8 = sphi %s471_s8, %s610_s8   ;;  %s435_s7 = sphi %s469_s7, %s609_s7   ;;  %s431_s6 = sphi %s467_s6, %s608_s6  }
   0x7   : > { %s29_s14 = sadd.s32 1, %s447_s10  ;;  %s38_s15 = sadd.s32 1, %s439_s8 }
   0x8   : > { %p31_p0 = scmp.ge.s32.totalorder %s29_s14, 2  ;;  %p45_p1 = scmp.ne.s32.totalorder %s439_s8, %s435_s7 }
   0x9   : > { %p46_p2 = scmp.eq.s32.totalorder %s451_s11, 0  ;;  %p51_p3 = scmp.ne.s32.totalorder %s435_s7, %s431_s6 }
   0xa   : > { %s614_s14 = smov (%p31_p0, %s29_s14), 0  ;;  %p52_p5 = scmp.eq.s32.totalorder %s261_s12, 0 }
   0xb   : > { %p508_p4 = por %p46_p2, %p45_p1  ;;  %s33_s17 = ssub.s32 %s447_s10, %s614_s14 }
   0xc   : > { %p77_p6 = scmp.eq.s32.totalorder %s261_s12, 1  ;;  %p36_p7 = scmp.eq.s32.totalorder %s33_s17, 0 }
   0xd   : > { %p514_p8 = por %p52_p5, %p51_p3  ;;  %p83_p10 = scmp.eq.s32.totalorder %s262_s13, 1 }
   0xe   : > { %p518_p9 = por %p77_p6, %p45_p1  ;;  %p291_p13 = scmp.lt.s32.totalorder %s451_s11, 2 }
   0xf   : > { %s523_s20 = scalar_select %p36_p7, %s439_s8, %s38_s15  }
  0x10   : > { %p525_p11 = por %p83_p10, %p51_p3  ;;  %s103_s22 = sand.u32 1, %s439_s8  }
  0x11   : > { %s265_s23 = sshll.u32 %s103_s22, 3  ;;  %s277_s24 = sshll.u32 %s447_s10, 7 }
  0x12   : > { %s115_s27 = scalar_lea.hbm %s600_s0, %s277_s24  ;;  %s107_s28 = scalar_lea.vmem [#allocation2], %s265_s23 }
  0x13   : > { %s116_s29 = sshll.u32 %s107_s28, 4  ;;  %p538_p0 = pnand %p291_p13, %p508_p4  ;;  %s117_s29 = int_to_ptr.vmem [resolvable:$true] %s116_s29 }
  0x14   : > { %p268_p1 = scmp.ge.s32.totalorder %s451_s11, 1  ;;  %s104_s2 = scalar_lea.sflag [#allocation3], %s103_s22 }
  0x15   : > { %p345_p2 = pneg %p538_p0  ;;  %s356_s3 = scalar_lea.vmem %s117_s29, 128 }
  0x16   : > { %p357_p3 = scmp.ne.s32.totalorder %s117_s29, %s356_s3  ;;  %s453_s4 = smov [#allocation2]  }
  0x17   : > { %s361_s5 = sshll.u32 %s453_s4, 4  ;;  %s362_s5 = int_to_ptr.vmem [resolvable:$false] %s361_s5 }
  0x18   : > { %p359_p5 = pnand %p357_p3, %p345_p2  ;;  %s363_s12 = scalar_lea.vmem %s362_s5, 256 }
  0x19   : > { %p364_p7 = scmp.lt.s32.totalorder %s117_s29, %s362_s5  ;;  %p365_p10 = scmp.lt.s32.totalorder %s363_s12, %s356_s3 }
  0x1a   : > { %p360_p6 = pneg %p359_p5 }
  0x1b   : > { %p366_p12 = por %p365_p10, %p364_p7 }
  0x1d   : > { %p367_p4 = pnand %p366_p12, %p360_p6 }
  0x1f   : > { %370 = shalt.err (!%p367_p4)
}
  0x20   : > { %s454_s13 = smov 64   ;;  %s455_s15 = smov 4  }
  0x21   : > { %286 = dma.hbm_to_vmem [thread:$0]  (!%p538_p0), %s115_s27, 128, %s117_s29, %s104_s2, %s454_s13, %s454_s13, %s455_s15  }
  0x22   : > { %p124_p13 = scmp.lt.s32.totalorder %s451_s11, 3 }
  0x24   : > { %p125_p2 = pnand %p268_p1, %p124_p13 }
  0x25   : > { %s551_s16 = sand.u32 (!%p125_p2), 1, %s435_s7  }
  0x26   : > { %128 = sbr.rel (%p125_p2) target bundleno = 68 (0x44), region = 24  ;;  %s269_s17 = sshll.u32 (!%p125_p2), %s551_s16, 3 }
  0x27   : > { %s131_s22 = scalar_lea.sflag (!%p125_p2), [#allocation3], %s551_s16  ;;  %s134_s23 = scalar_lea.vmem (!%p125_p2), [#allocation2], %s269_s17 }
  0x2b   : > { %422 = dma.done.wait (%p514_p8), %s131_s22, 128  }
  0x2c   : > { %424 = vsyncadd (%p514_p8), %s131_s22, 4294967168  ;;  %s270_s24 = sshll.u32 %s551_s16, 2  ;;  %s278_s27 = sshll.u32 %s443_s9, 6  ;;  %v155_v0 = vld [vmem:[%s134_s23] sm:$0xf] }
  0x2d   : > { %s152_s25 = scalar_lea.vmem [#allocation5], %s270_s24  ;;  %v271_v1 = vld [vmem:[%s134_s23 + $0x4] sm:$0xf]  ;;  %s175_s30 = scalar_lea.hbm %s601_s1, %s278_s27 }
  0x2e   : > { %s177_s26 = sshll.u32 %s152_s25, 4  ;;  %v158_v2 = vmax.f32 %v155_v0, %v271_v1  ;;  %s161_s2 = scalar_lea.sflag [#allocation4], %s551_s16  ;;  %s178_s26 = int_to_ptr.vmem [resolvable:$true] %s177_s26 }
  0x2f   : > { %s371_s18 = scalar_lea.vmem %s178_s26, 64  ;;  %s456_s3 = smov [#allocation5]  }
  0x30   : > { %159 = vst [vmem:[%s152_s25] sm:$0xf] %v158_v2  ;;  %p372_p8 = scmp.ne.s32.totalorder %s178_s26, %s371_s18  ;;  %s375_s4 = sshll.u32 %s456_s3, 4  ;;  %s376_s4 = int_to_ptr.vmem [resolvable:$false] %s375_s4 }
  0x31   : > { %s377_s5 = scalar_lea.vmem %s376_s4, 128  ;;  %p378_p1 = scmp.lt.s32.totalorder %s178_s26, %s376_s4 }
  0x32   : > { %p373_p12 = pnand %p372_p8, %p518_p9  ;;  %p379_p3 = scmp.lt.s32.totalorder %s377_s5, %s371_s18 }
  0x34   : > { %p374_p0 = pneg %p373_p12  ;;  %p380_p5 = por %p379_p3, %p378_p1 }
  0x36   : > { %p381_p6 = pnand %p380_p5, %p374_p0 }
  0x38   : > { %384 = shalt.err (!%p381_p6)
}
  0x39   : > { %s385_s9 = scalar_lea.hbm %s175_s30, 64  ;;  %s389_s15 = scalar_lea.hbm %s601_s1, 128 }
  0x3a   : > { %p386_p7 = scmp.ne.s32.totalorder %s175_s30, %s385_s9  ;;  %p390_p13 = scmp.lt.s32.totalorder %s175_s30, %s601_s1 }
  0x3b   : > { %p391_p2 = scmp.lt.s32.totalorder %s389_s15, %s385_s9 }
  0x3c   : > { %p387_p10 = pnand %p386_p7, %p518_p9 }
  0x3d   : > { %p392_p8 = por %p391_p2, %p390_p13 }
  0x3e   : > { %p388_p4 = pneg %p387_p10 }
  0x40   : > { %p393_p12 = pnand %p392_p8, %p388_p4 }
  0x42   : > { %396 = shalt.err (!%p393_p12)
}
  0x43   : > { %281 = dma.vmem_to_hbm [thread:$0]  (%p518_p9), %s178_s26, 64, %s175_s30, %s161_s2  }
  0x44 PF: > { %s189_s22 = sand.u32 1, %s431_s6   ;;  %p607_p0 = scmp.ge.s32.totalorder %s451_s11, 2 }
  0x45   : > { %s190_s23 = scalar_lea.sflag [#allocation4], %s189_s22 }
  0x46   : > { %p288_p1 = pnand %p607_p0, %p525_p11 }
  0x48   : > { %p289_p3 = pneg %p288_p1 }
  0x4a   : > { %426 = dma.done.wait (%p289_p3), %s190_s23, 64  }
  0x4b   : > { %428 = vsyncadd (%p289_p3), %s190_s23, 4294967232  ;;  %s17_s11 = sadd.s32 1, %s451_s11   ;;  %s608_s6 = smov %s435_s7 }
  0x4c   : > { %p14_p5 = scmp.ge.s32.totalorder %s17_s11, 4   ;;  %s609_s7 = smov %s439_s8 }
  0x4d   : > { %s610_s8 = smov %s523_s20  ;;  %s611_s9 = smov %s447_s10 }
  0x4e   : > { %s612_s10 = smov %s614_s14  ;;  %16 = sbr.rel (!%p14_p5) target bundleno = 6 (0x6), region = 70 }
  0x53   :  { %195 = vsyncpa [#allocation3], 1 }
  0x54   :  { %197 = vsyncpa [#allocation3 + $0x1], 1 }
  0x55   :  { %198 = vsyncpa [#allocation4], 1 }
  0x56   :  { %200 = vsyncpa [#allocation4 + $0x1], 1 }

</bundles_post_ra>
